<compile_context>
chip_gen: v7x
topology: tpu7x:2x2x1
jax: 0.10.0
libtpu: 0.0.40
codegen_flags: <defaults>
</compile_context>

<pallas_src>
import functools

import jax
import jax.numpy as jnp
from jax.experimental import pallas as pl
from jax.experimental.pallas import tpu as pltpu

_LANES = 128
_TARGET_BLOCK_BYTES = 4 * 1024 * 1024   # per-input, per-buffer block size target


def _round_up(a, b):
    return (a + b - 1) // b * b


def _tensorcores_per_device():
    """Best-effort TensorCores per JAX device: 1 on v5e/v6e, 2 on v4/v5p/v7x."""
    try:
        kind = jax.devices()[0].device_kind.lower()
    except Exception:
        return 1
    if any(t in kind for t in ("lite", "v5e", "v6e", "trillium")):
        return 1                    # single-TensorCore chips
    if any(t in kind for t in ("v4", "v5p", "v5", "v7", "7x", "tpu7")):
        return 2                    # megacore (v4/v5p) or dual-TC (v7x)
    return 1                        # unknown / v2 / v3: safe default


def _charbonnier_kernel(x_ref, y_ref, o_ref, acc_ref, *, eps, rows_total,
                        blocks_per_core):
    c = pl.program_id(0)           # core-split axis ("parallel")
    j = pl.program_id(1)           # reduction axis ("arbitrary")

    @pl.when(j == 0)
    def _():
        acc_ref[...] = jnp.zeros_like(acc_ref)

    x = x_ref[...].astype(jnp.float32)
    y = y_ref[...].astype(jnp.float32)
    d = x - y
    val = jnp.sqrt(d * d + jnp.float32(eps) * jnp.float32(eps))

    block_rows, lanes = x_ref.shape
    acc_rows = acc_ref.shape[0]
    block_idx = c * blocks_per_core + j        # logical row-block of the 2D array

    def _accumulate(v):
        # (BLOCK_ROWS,128) -> (ACC_ROWS,128) partial sums: pure VPU adds with
        # ACC_ROWS/8 independent vreg chains, no cross-lane work in the hot path.
        acc_ref[...] += jnp.sum(
            v.reshape(block_rows // acc_rows, acc_rows, lanes), axis=0)

    # Only the block overhanging the array (or the duplicated trailing block on the
    # second core) needs masking; every other block takes the cheap unmasked path.
    is_edge = (block_idx + 1) * block_rows > rows_total

    @pl.when(jnp.logical_not(is_edge))
    def _():
        _accumulate(val)

    @pl.when(is_edge)
    def _():
        row = (block_idx * block_rows
               + jax.lax.broadcasted_iota(jnp.int32, (block_rows, lanes), 0))
        # select (NOT multiply): discards NaN/garbage from the stale VMEM tail.
        _accumulate(jnp.where(row < rows_total, val, jnp.float32(0.0)))

    @pl.when(j == pl.num_programs(1) - 1)
    def _():
        # Single cross-lane (XLU) reduce per core, written once to SMEM.
        o_ref[0, 0] = jnp.sum(acc_ref[...])


def charbonnier_loss(x, y, eps=1e-3):
    assert x.shape == y.shape, "x and y must have identical shapes"
    n = int(x.size)
    assert n > 0

    itemsize = jnp.dtype(x.dtype).itemsize
    granule = {4: 8, 2: 16, 1: 32}.get(itemsize, 8)   # sublane alignment per dtype
    # ~4 MiB per input block: large enough to bury the per-step overhead even at
    # v7x bandwidth, small enough that 2 inputs x 2-3 buffers fits every VMEM.
    target_rows = max(_TARGET_BLOCK_BYTES // (_LANES * itemsize), 8 * granule)

    xf = jnp.ravel(x)
    yf = jnp.ravel(y)

    rows = pl.cdiv(n, _LANES)
    if rows >= target_rows:
        block_rows = target_rows
        arr_rows = rows            # last block may overhang; masked in-kernel
    else:
        block_rows = _round_up(rows, granule)
        arr_rows = block_rows      # single block; pad rows up to it (tiny input)

    padded = arr_rows * _LANES
    pad = padded - n
    if pad:
        # Zero padding: each padded element contributes exactly sqrt(eps^2); we
        # subtract that as a scalar correction below.
        # TODO(synk): this still materializes a padded HBM copy when n % 128 != 0;
        # a 1D-block bulk+tail split would avoid it (see header note).
        xf = jnp.pad(xf, (0, pad))
        yf = jnp.pad(yf, (0, pad))
    x2d = xf.reshape(arr_rows, _LANES)
    y2d = yf.reshape(arr_rows, _LANES)

    total_blocks = pl.cdiv(arr_rows, block_rows)
    cores_per_device = _tensorcores_per_device()
    num_cores = 2 if (cores_per_device >= 2 and total_blocks >= 2) else 1
    blocks_per_core = pl.cdiv(total_blocks, num_cores)

    # Parallel accumulator chains: 64 rows when the block size allows it, else 8.
    acc_rows = 64 if block_rows % 64 == 0 else 8

    def in_map(c, j):
        # Clamp so a possible extra trailing step on the second core re-reads a
        # valid block (fully masked out in-kernel) instead of going out of bounds.
        return (jnp.minimum(c * blocks_per_core + j, total_blocks - 1), 0)

    in_spec = pl.BlockSpec((block_rows, _LANES), in_map)
    # Triple-buffer the streaming inputs on 1-TC chips (128 MiB VMEM) with long
    # grids to absorb DMA jitter; skip on multi-TC chips (v7x: 64 MiB per TC).
    if cores_per_device == 1 and blocks_per_core >= 4 and hasattr(pl, "Buffered"):
        try:
            in_spec = pl.BlockSpec((block_rows, _LANES), in_map,
                                   pipeline_mode=pl.Buffered(3))
        except TypeError:
            pass   # BlockSpec without pipeline_mode: keep default double buffering

    vmem_limit = (48 if cores_per_device == 1 else 32) * 1024 * 1024

    kernel = functools.partial(
        _charbonnier_kernel, eps=float(eps), rows_total=arr_rows,
        blocks_per_core=blocks_per_core)

    cost = pl.CostEstimate(
        flops=4 * n,                   # sub, mul, add, accumulate per element
        transcendentals=n,             # one sqrt per element
        bytes_accessed=2 * padded * itemsize + 4 * num_cores)

    partials = pl.pallas_call(
        kernel,
        out_shape=jax.ShapeDtypeStruct((num_cores, 1), jnp.float32),
        grid_spec=pltpu.PrefetchScalarGridSpec(
            num_scalar_prefetch=0,
            grid=(num_cores, blocks_per_core),
            in_specs=[in_spec, in_spec],
            out_specs=pl.BlockSpec((1, 1), lambda c, j: (c, 0),
                                   memory_space=pltpu.SMEM),
            scratch_shapes=[pltpu.VMEM((acc_rows, _LANES), jnp.float32)],
        ),
        compiler_params=pltpu.CompilerParams(
            dimension_semantics=("parallel", "arbitrary"),
            vmem_limit_bytes=vmem_limit,
        ),
        cost_estimate=cost,
    )(x2d, y2d)

    total = jnp.sum(partials)
    eps32 = jnp.float32(eps)
    pad_correction = jnp.float32(pad) * jnp.sqrt(eps32 * eps32)
    return (total - pad_correction) / jnp.float32(n)


def _reference(x, y, eps=1e-3):
    diff = x - y
    return jnp.mean(jnp.sqrt(diff * diff + jnp.float32(eps) * jnp.float32(eps)))


if __name__ == "__main__":
    def _check(xa, ya, rtol, name):
        loss = jax.block_until_ready(charbonnier_loss(xa, ya, eps=1e-3))
        ref = _reference(xa.astype(jnp.float32), ya.astype(jnp.float32), eps=1e-3)
        assert jnp.allclose(loss, ref, rtol=rtol, atol=1e-6), (name, loss, ref)

    # Primary small example consistent with the module's NCHW image inputs.
    kx, ky = jax.random.split(jax.random.PRNGKey(0))
    x = jax.random.normal(kx, (2, 4, 16, 16), dtype=jnp.float32)
    y = jax.random.normal(ky, (2, 4, 16, 16), dtype=jnp.float32)
    _check(x, y, 1e-5, "small f32")

    # Multi-block grid, possible 2-way core split on dual-TC chips.
    kx2, ky2 = jax.random.split(jax.random.PRNGKey(1))
    x2 = jax.random.normal(kx2, (2, 4, 512, 320), dtype=jnp.float32)
    y2 = jax.random.normal(ky2, (2, 4, 512, 320), dtype=jnp.float32)
    _check(x2, y2, 1e-4, "multi-block f32")

    # Long grid (>=4 blocks/core): exercises masked overhang block and the
    # triple-buffered input path on single-TensorCore chips.
    kx3, ky3 = jax.random.split(jax.random.PRNGKey(2))
    x3 = jax.random.normal(kx3, (2, 4, 1023, 640), dtype=jnp.float32)
    y3 = jax.random.normal(ky3, (2, 4, 1023, 640), dtype=jnp.float32)
    _check(x3, y3, 1e-4, "long-grid f32")

    # bf16 pass-through (kernel upcasts to f32 internally), multi-block + edge.
    kx4, ky4 = jax.random.split(jax.random.PRNGKey(3))
    x4 = jax.random.normal(kx4, (2, 4, 512, 640), dtype=jnp.bfloat16)
    y4 = jax.random.normal(ky4, (2, 4, 512, 640), dtype=jnp.bfloat16)
    _check(x4, y4, 1e-4, "bf16 multi-block")

    # Element count not divisible by 128 (padding + exact scalar correction).
    kx5, ky5 = jax.random.split(jax.random.PRNGKey(4))
    x5 = jax.random.normal(kx5, (3, 5, 37, 21), dtype=jnp.float32)
    y5 = jax.random.normal(ky5, (3, 5, 37, 21), dtype=jnp.float32)
    _check(x5, y5, 1e-4, "padded odd-size f32")

    print("KERNEL_OK")
</pallas_src>

<mosaic_0001>
module attributes {stable_mosaic.version = 11 : i64} {
  func.func @_charbonnier_kernel(%arg0: i32, %arg1: i32, %arg2: memref<16x128xf32, #tpu.memory_space<vmem>>, %arg3: memref<16x128xf32, #tpu.memory_space<vmem>>, %arg4: memref<1x1xf32, #tpu.memory_space<smem>>, %arg5: memref<8x128xf32, #tpu.memory_space<vmem>>) attributes {dimension_semantics = [#tpu.dimension_semantics<parallel>, #tpu.dimension_semantics<arbitrary>], iteration_bounds = array<i64: 1, 1>, scalar_prefetch = 0 : i64, scratch_operands = 1 : i64, tpu.core_type = #tpu.core_type<tc>, window_params = [{transform_indices = @transform_0, window_bounds = array<i64: 16, 128>}, {transform_indices = @transform_1, window_bounds = array<i64: 16, 128>}, {transform_indices = @transform_2, window_bounds = array<i64: 1, 1>}]} {
    %c0_i32 = arith.constant 0 : i32
    %0 = arith.cmpi eq, %arg1, %c0_i32 : i32
    %1 = arith.extui %0 : i1 to i32
    %c0_i32_0 = arith.constant 0 : i32
    %2 = arith.cmpi ne, %1, %c0_i32_0 : i32
    scf.if %2 {
      %cst_11 = arith.constant 0.000000e+00 : f32
      %24 = vector.broadcast %cst_11 : f32 to vector<8x128xf32>
      %c0_12 = arith.constant 0 : index
      %c0_13 = arith.constant 0 : index
      %25 = vector.load %arg5[%c0_12, %c0_13] : memref<8x128xf32, #tpu.memory_space<vmem>>, vector<8x128xf32>
      tpu.vector_store %arg5[%c0_12, %c0_13], %24 {strides = array<i32>} : memref<8x128xf32, #tpu.memory_space<vmem>>, vector<8x128xf32>,
    } else {
    }
    %c0 = arith.constant 0 : index
    %c0_1 = arith.constant 0 : index
    %3 = vector.load %arg2[%c0, %c0_1] : memref<16x128xf32, #tpu.memory_space<vmem>>, vector<16x128xf32>
    %c0_2 = arith.constant 0 : index
    %c0_3 = arith.constant 0 : index
    %4 = vector.load %arg3[%c0_2, %c0_3] : memref<16x128xf32, #tpu.memory_space<vmem>>, vector<16x128xf32>
    %5 = arith.subf %3, %4 : vector<16x128xf32>
    %6 = arith.mulf %5, %5 : vector<16x128xf32>
    %cst = arith.constant 1.000000e-03 : f32
    %cst_4 = arith.constant 1.000000e-03 : f32
    %7 = arith.mulf %cst, %cst_4 : f32
    %8 = vector.broadcast %7 : f32 to vector<16x128xf32>
    %9 = arith.addf %6, %8 : vector<16x128xf32>
    %10 = math.sqrt %9 : vector<16x128xf32>
    %c1_i32 = arith.constant 1 : i32
    %11 = arith.muli %arg0, %c1_i32 : i32
    %12 = arith.addi %11, %arg1 : i32
    %c1_i32_5 = arith.constant 1 : i32
    %13 = arith.addi %12, %c1_i32_5 : i32
    %c16_i32 = arith.constant 16 : i32
    %14 = arith.muli %13, %c16_i32 : i32
    %c16_i32_6 = arith.constant 16 : i32
    %15 = arith.cmpi sgt, %14, %c16_i32_6 : i32
    %true = arith.constant true
    %16 = arith.xori %15, %true : i1
    %17 = arith.extui %16 : i1 to i32
    %c0_i32_7 = arith.constant 0 : i32
    %18 = arith.cmpi ne, %17, %c0_i32_7 : i32
    scf.if %18 {
      %c0_11 = arith.constant 0 : index
      %c0_12 = arith.constant 0 : index
      %24 = vector.load %arg5[%c0_11, %c0_12] : memref<8x128xf32, #tpu.memory_space<vmem>>, vector<8x128xf32>
      %25 = vector.shape_cast %10 : vector<16x128xf32> to vector<2x8x128xf32>
      %cst_13 = arith.constant dense<0.000000e+00> : vector<8x128xf32>
      %26 = vector.multi_reduction <add>, %25, %cst_13 [0] : vector<2x8x128xf32> to vector<8x128xf32>
      %27 = arith.addf %24, %26 : vector<8x128xf32>
      %c0_14 = arith.constant 0 : index
      %c0_15 = arith.constant 0 : index
      %28 = vector.load %arg5[%c0_14, %c0_15] : memref<8x128xf32, #tpu.memory_space<vmem>>, vector<8x128xf32>
      tpu.vector_store %arg5[%c0_14, %c0_15], %27 {strides = array<i32>} : memref<8x128xf32, #tpu.memory_space<vmem>>, vector<8x128xf32>,
    } else {
    }
    %19 = arith.extui %15 : i1 to i32
    %c0_i32_8 = arith.constant 0 : i32
    %20 = arith.cmpi ne, %19, %c0_i32_8 : i32
    scf.if %20 {
      %c16_i32_11 = arith.constant 16 : i32
      %24 = arith.muli %12, %c16_i32_11 : i32
      %25 = tpu.iota {dimensions = array<i32: 0>} : vector<16x128xi32>
      %26 = vector.broadcast %24 : i32 to vector<16x128xi32>
      %27 = arith.addi %26, %25 : vector<16x128xi32>
      %c16_i32_12 = arith.constant 16 : i32
      %28 = vector.broadcast %c16_i32_12 : i32 to vector<16x128xi32>
      %29 = arith.cmpi slt, %27, %28 : vector<16x128xi32>
      %cst_13 = arith.constant 0.000000e+00 : f32
      %30 = vector.broadcast %cst_13 : f32 to vector<16x128xf32>
      %31 = arith.select %29, %10, %30 : vector<16x128xi1>, vector<16x128xf32>
      %c0_14 = arith.constant 0 : index
      %c0_15 = arith.constant 0 : index
      %32 = vector.load %arg5[%c0_14, %c0_15] : memref<8x128xf32, #tpu.memory_space<vmem>>, vector<8x128xf32>
      %33 = vector.shape_cast %31 : vector<16x128xf32> to vector<2x8x128xf32>
      %cst_16 = arith.constant dense<0.000000e+00> : vector<8x128xf32>
      %34 = vector.multi_reduction <add>, %33, %cst_16 [0] : vector<2x8x128xf32> to vector<8x128xf32>
      %35 = arith.addf %32, %34 : vector<8x128xf32>
      %c0_17 = arith.constant 0 : index
      %c0_18 = arith.constant 0 : index
      %36 = vector.load %arg5[%c0_17, %c0_18] : memref<8x128xf32, #tpu.memory_space<vmem>>, vector<8x128xf32>
      tpu.vector_store %arg5[%c0_17, %c0_18], %35 {strides = array<i32>} : memref<8x128xf32, #tpu.memory_space<vmem>>, vector<8x128xf32>,
    } else {
    }
    %c0_i32_9 = arith.constant 0 : i32
    %21 = arith.cmpi eq, %arg1, %c0_i32_9 : i32
    %22 = arith.extui %21 : i1 to i32
    %c0_i32_10 = arith.constant 0 : i32
    %23 = arith.cmpi ne, %22, %c0_i32_10 : i32
    scf.if %23 {
      %c0_11 = arith.constant 0 : index
      %c0_12 = arith.constant 0 : index
      %24 = vector.load %arg5[%c0_11, %c0_12] : memref<8x128xf32, #tpu.memory_space<vmem>>, vector<8x128xf32>
      %25 = vector.shape_cast %24 : vector<8x128xf32> to vector<1x8x128xf32>
      %cst_13 = arith.constant dense<0.000000e+00> : vector<1xf32>
      %26 = vector.multi_reduction <add>, %25, %cst_13 [1, 2] : vector<1x8x128xf32> to vector<1xf32>
      %27 = vector.shape_cast %26 : vector<1xf32> to vector<1x1x1xf32>
      %28 = vector.extract %27[0, 0, 0] : f32 from vector<1x1x1xf32>
      %c0_14 = arith.constant 0 : index
      %c0_15 = arith.constant 0 : index
      %29 = memref.load %arg4[%c0_14, %c0_15] : memref<1x1xf32, #tpu.memory_space<smem>>
      memref.store %28, %arg4[%c0_14, %c0_15] : memref<1x1xf32, #tpu.memory_space<smem>>
    } else {
    }
    return
  }
  func.func @transform_0(%arg0: i32, %arg1: i32) -> (i32, i32) {
    %c1_i32 = arith.constant 1 : i32
    %0 = arith.muli %arg0, %c1_i32 : i32
    %1 = arith.addi %0, %arg1 : i32
    %c0_i32 = arith.constant 0 : i32
    %2 = arith.minsi %1, %c0_i32 : i32
    %c0_i32_0 = arith.constant 0 : i32
    %c0_i32_1 = arith.constant 0 : i32
    return %2, %c0_i32_0 : i32, i32
  }
  func.func @transform_1(%arg0: i32, %arg1: i32) -> (i32, i32) {
    %c1_i32 = arith.constant 1 : i32
    %0 = arith.muli %arg0, %c1_i32 : i32
    %1 = arith.addi %0, %arg1 : i32
    %c0_i32 = arith.constant 0 : i32
    %2 = arith.minsi %1, %c0_i32 : i32
    %c0_i32_0 = arith.constant 0 : i32
    %c0_i32_1 = arith.constant 0 : i32
    return %2, %c0_i32_0 : i32, i32
  }
  func.func @transform_2(%arg0: i32, %arg1: i32) -> (i32, i32) {
    %c0_i32 = arith.constant 0 : i32
    %c0_i32_0 = arith.constant 0 : i32
    return %arg0, %c0_i32 : i32, i32
  }
}

</mosaic_0001>

<bundles_post_ra>
// kernel: tpu_custom_call.1
= control target key start
LH: loop header
LB: loop body
LE: loop exit
PB: predicated region body
PF: predicated region fallthrough
CT: control target
= control target key end

     0   :  { %7 = vsyncpa [#allocation4], 0  ;;  %s280_s0 = inlined_call_operand.hbm [shape: f32[16,128], index: 0, kind: input, shape index: {}]   ;;  %s281_s1 = inlined_call_operand.hbm [shape: f32[16,128], index: 1, kind: input, shape index: {}]   ;;  %s282_s2 = inlined_call_operand.hbm [shape: f32[1,1], index: 2, kind: output, shape index: {}]  }
   0x1   :  { %8 = vsyncpa [#allocation7], 0 }
   0x2   :  { %9 = vsyncpa [#allocation5], 0  ;;  %s224_s9 = smov [#allocation3]   ;;  %s164_s13 = scalar_lea.hbm %s280_s0, 256 }
   0x3   :  { %s21_s10 = sshll.u32 %s224_s9, 4  ;;  %p165_p0 = scmp.ne.s32.totalorder %s280_s0, %s164_s13  ;;  %s22_s10 = int_to_ptr.vmem [resolvable:$true] %s21_s10 }
   0x4   :  { %p168_p1 = scmp.lt.u32.totalorder %s164_s13, %s280_s0 }
   0x6   :  { %p170_p2 = pnand %p168_p1, %p165_p0 }
   0x8   :  { %173 = shalt.err (!%p170_p2)
}
   0x9   :  { %s174_s18 = scalar_lea.vmem %s22_s10, 256  ;;  %p179_p4 = scmp.lt.s32.totalorder %s22_s10, %s22_s10 }
   0xa   :  { %p175_p3 = scmp.ne.s32.totalorder %s22_s10, %s174_s18  ;;  %p180_p5 = scmp.lt.s32.totalorder %s174_s18, %s174_s18 }
   0xc   :  { %p181_p6 = por %p180_p5, %p179_p4 }
   0xe   :  { %p182_p7 = pnand %p181_p6, %p175_p3 }
  0x10   :  { %185 = shalt.err (!%p182_p7)
}
  0x11   :  { %s225_s19 = smov 128   ;;  %s226_s20 = smov 8  }
  0x12   :  { %27 = dma.hbm_to_vmem [thread:$0]  %s280_s0, 256, %s22_s10, [#allocation4], %s225_s19, %s225_s19, %s226_s20  }
  0x13   :  { %s227_s23 = smov [#allocation6]   ;;  %s186_s27 = scalar_lea.hbm %s281_s1, 256 }
  0x14   :  { %s39_s24 = sshll.u32 %s227_s23, 4  ;;  %p187_p8 = scmp.ne.s32.totalorder %s281_s1, %s186_s27  ;;  %s40_s24 = int_to_ptr.vmem [resolvable:$true] %s39_s24 }
  0x15   :  { %p190_p9 = scmp.lt.u32.totalorder %s186_s27, %s281_s1 }
  0x17   :  { %p192_p10 = pnand %p190_p9, %p187_p8 }
  0x19   :  { %195 = shalt.err (!%p192_p10)
}
  0x1a   :  { %s196_s4 = scalar_lea.vmem %s40_s24, 256  ;;  %p201_p12 = scmp.lt.s32.totalorder %s40_s24, %s40_s24 }
  0x1b   :  { %p197_p11 = scmp.ne.s32.totalorder %s40_s24, %s196_s4  ;;  %p202_p13 = scmp.lt.s32.totalorder %s196_s4, %s196_s4 }
  0x1d   :  { %p203_p0 = por %p202_p13, %p201_p12 }
  0x1f   :  { %p204_p1 = pnand %p203_p0, %p197_p11 }
  0x21   :  { %207 = shalt.err (!%p204_p1)
}
  0x22   :  { %45 = dma.hbm_to_vmem [thread:$0]  %s281_s1, 256, %s40_s24, [#allocation7], %s225_s19, %s225_s19, %s226_s20  }
  0x23   :  { %218 = dma.done.wait [#allocation4], 256  }
  0x24   :  { %219 = vsyncadd [#allocation4], 4294967040 }
  0x25   :  { %220 = dma.done.wait [#allocation7], 256  }
  0x26   :  { %221 = vsyncadd [#allocation7], 4294967040  ;;  %v65_v0 = vld [vmem:[#allocation3] sm:$0xff]  ;;  %v66_v1 = vld [vmem:[#allocation3 + $0x8] sm:$0xff]  ;;  %s208_s8 = scalar_lea.hbm %s282_s2, 16 }
  0x27   :  { %v67_v2 = vld [vmem:[#allocation6] sm:$0xff]  ;;  %v68_v3 = vld [vmem:[#allocation6 + $0x8] sm:$0xff]  ;;  %p209_p2 = scmp.ne.s32.totalorder %s282_s2, %s208_s8  ;;  %p212_p3 = scmp.lt.u32.totalorder %s208_s8, %s282_s2 }
  0x28   :  { %v69_v4 = vsub.f32 %v65_v0, %v67_v2  ;;  %v70_v5 = vsub.f32 %v66_v1, %v68_v3 }
  0x29   :  { %p214_p4 = pnand %p212_p3, %p209_p2 }
  0x2a   :  { %v71_v6 = vmul.f32 %v69_v4, %v69_v4  ;;  %v72_v7 = vmul.f32 %v70_v5, %v70_v5 }
  0x2c   :  { %v73_v8 = vadd.f32 1.0000001e-06, %v71_v6  ;;  %v74_v9 = vadd.f32 1.0000001e-06, %v72_v7 }
  0x2e   :  { %160 = vrsqrt.f32 %v73_v8  ;;  %vm77_vm0 = vcmp.eq.f32.partialorder %v73_v8, inf  ;;  %v80_v11 = vand.u32 2147483648, %v73_v8  ;;  %vm79_vm1 = vcmp.eq.f32.partialorder %v73_v8, 0.0 }
  0x2f   :  { %162 = vrsqrt.f32 %v74_v9  ;;  %vm84_vm2 = vcmp.eq.f32.partialorder %v74_v9, inf  ;;  %v87_v14 = vand.u32 2147483648, %v74_v9  ;;  %vm86_vm3 = vcmp.eq.f32.partialorder %v74_v9, 0.0 }
  0x38   :  { %v161_v10 = vpop.eup %160 }
  0x39   :  { %v163_v12 = vpop.eup %162  ;;  %v76_v13 = vmul.f32 %v161_v10, %v73_v8 }
  0x3a   :  { %v83_v15 = vmul.f32 %v163_v12, %v74_v9 }
  0x3b   :  { %v78_v16 = vsel %vm77_vm0, %v73_v8, %v76_v13 }
  0x3c   :  { %v81_v17 = vsel %vm79_vm1, %v80_v11, %v78_v16  ;;  %v85_v18 = vsel %vm84_vm2, %v74_v9, %v83_v15 }
  0x3d   :  { %v88_v19 = vsel %vm86_vm3, %v87_v14, %v85_v18 }
  0x3e   :  { %v98_v20 = vadd.f32 %v88_v19, %v81_v17 }
  0x40   :  { %123 = vadd.xlane.f32.xlu0 %v98_v20 }
  0xcd   :  { %v124_v21 = vpop.xlane.xlu0 %123 }
  0xce   :  { %v125_v22 = vrot.slane %v124_v21, 4 }
  0xd0   :  { %v126_v23 = vadd.f32 %v125_v22, %v124_v21 }
  0xd2   :  { %v127_v24 = vrot.slane %v126_v23, 2 }
  0xd4   :  { %v128_v25 = vadd.f32 %v127_v24, %v126_v23 }
  0xd6   :  { %v129_v26 = vrot.slane %v128_v25, 1 }
  0xd8   :  { %v130_v27 = vadd.f32 %v129_v26, %v128_v25 }
  0xda   :  { %153 = vpush %v130_v27 }
 0x10b   :  { %s154_s1 = spop %153 }
 0x10c   :  { %133 = sst [smem:[#allocation8]] %s154_s1 }
 0x10d   :  { %217 = shalt.err (!%p214_p4)
}
 0x10e   :  { %s228_s13 = smov [#allocation8]  }
 0x10f   :  { %141 = dma.smem_to_hbm %s228_s13, 16, %s282_s2, [#allocation5]  }
 0x110   :  { %222 = dma.done.wait [#allocation5], 16  }
 0x111   :  { %223 = vsyncadd [#allocation5], 4294967280 }
 0x112   :  { %145 = sfence }
 0x113   :  { %146 = vsyncpa [#allocation4], 1 }
 0x114   :  { %147 = vsyncpa [#allocation7], 1 }
 0x115   :  { %148 = vsyncpa [#allocation5], 1 }

</bundles_post_ra>
